<compile_context>
chip_gen: v5e
topology: v5e:2x2
jax: 0.10.0
libtpu: 0.0.40
codegen_flags: <defaults>
</compile_context>

<pallas_src>
import functools
import math

import jax
import jax.numpy as jnp
from jax.experimental import pallas as pl
from jax.experimental.pallas import tpu as pltpu


def _round_up(x, m):
    return ((x + m - 1) // m) * m


def _cdiv(a, b):
    return -(-a // b)


def _split_tile(size, align, max_tile):
    """Pick (tile, padded_size): tile is a multiple of `align`, <= max(max_tile,
    align); padded_size = tile * num_blocks >= size with minimal padding."""
    padded_min = _round_up(size, align)
    max_tile = max(align, (max_tile // align) * align)
    if padded_min <= max_tile:
        return padded_min, padded_min
    nblocks = _cdiv(padded_min, max_tile)
    tile = _round_up(_cdiv(padded_min, nblocks), align)
    return tile, tile * nblocks


# ----------------------------------------------------------------------------
# Kernels: one (tm, tn) output tile, accumulated over the K (last) grid axis.
# ----------------------------------------------------------------------------
def _linear_kernel_inplace(x_ref, w_ref, b_ref, o_ref, *, activation):
    """out_dtype == f32: accumulate directly into the resident output block."""
    k = pl.program_id(2)

    @pl.when(k == 0)
    def _():
        o_ref[...] = jnp.zeros_like(o_ref)

    o_ref[...] += jnp.dot(
        x_ref[...], w_ref[...], preferred_element_type=jnp.float32
    )

    @pl.when(k == pl.num_programs(2) - 1)
    def _():
        y = o_ref[...] + b_ref[...]
        if activation == "relu":
            y = jnp.maximum(y, 0.0)
        o_ref[...] = y


def _linear_kernel_acc(x_ref, w_ref, b_ref, o_ref, acc_ref, *, activation):
    """Non-f32 output: f32 VMEM accumulator, cast on the final K step."""
    k = pl.program_id(2)

    @pl.when(k == 0)
    def _():
        acc_ref[...] = jnp.zeros_like(acc_ref)

    acc_ref[...] += jnp.dot(
        x_ref[...], w_ref[...], preferred_element_type=jnp.float32
    )

    @pl.when(k == pl.num_programs(2) - 1)
    def _():
        y = acc_ref[...] + b_ref[...]
        if activation == "relu":
            y = jnp.maximum(y, 0.0)
        o_ref[...] = y.astype(o_ref.dtype)


# ----------------------------------------------------------------------------
# Wrapper
# ----------------------------------------------------------------------------
def pallas_linear(
    x,
    w_t,
    b=None,
    *,
    activation="none",
    max_tm=512,
    max_tn=512,
    max_tk=512,
    out_dtype=jnp.float32,
):
    """y = act(x @ w_t + b).

    x:   (M, K) activations.
    w_t: (Kw, N) transposed weight; Kw >= K is allowed if rows K..Kw-1 are zero
         (pre-padded weights -> no per-call weight pad).
    b:   (N,) or (1, N) bias, or None.
    """
    M, K = x.shape
    Kw, N = w_t.shape
    assert Kw >= K, (Kw, K)

    tm, Mp = _split_tile(M, 8, max_tm)
    tn, Np = _split_tile(N, 128, max_tn)
    tk, Kp = _split_tile(Kw, 128, max_tk)

    # Pad/cast only when the static shapes/dtypes actually require it.  When
    # the caller pre-pads/pre-casts (PallasLinear), these emit no XLA ops.
    if w_t.dtype != x.dtype:
        w_t = w_t.astype(x.dtype)
    if (Mp, Kp) != (M, K):
        x = jnp.pad(x, ((0, Mp - M), (0, Kp - K)))
    if (Kp, Np) != (Kw, N):
        w_t = jnp.pad(w_t, ((0, Kp - Kw), (0, Np - N)))

    if b is None:
        b2 = jnp.zeros((1, Np), jnp.float32)
    else:
        b2 = jnp.asarray(b, jnp.float32).reshape(1, -1)
        if b2.shape[1] != Np:
            b2 = jnp.pad(b2, ((0, 0), (0, Np - b2.shape[1])))

    grid = (Mp // tm, Np // tn, Kp // tk)  # reduction (K) axis last

    use_inplace = jnp.dtype(out_dtype) == jnp.dtype(jnp.float32)

    in_itemsize = jnp.dtype(x.dtype).itemsize
    out_itemsize = jnp.dtype(out_dtype).itemsize
    vmem_bytes = (
        2 * (tm * tk + tk * tn) * in_itemsize  # double-buffered x / w tiles
        + 2 * tm * tn * out_itemsize           # output buffers
        + 2 * tn * 4                           # bias
        + (0 if use_inplace else tm * tn * 4)  # f32 accumulator scratch
    )
    vmem_limit = None
    if vmem_bytes > 12 * 2**20:
        vmem_limit = min(64 * 2**20, int(vmem_bytes * 1.5))

    if use_inplace:
        kernel = functools.partial(_linear_kernel_inplace, activation=activation)
        scratch_shapes = []
    else:
        kernel = functools.partial(_linear_kernel_acc, activation=activation)
        scratch_shapes = [pltpu.VMEM((tm, tn), jnp.float32)]

    out = pl.pallas_call(
        kernel,
        out_shape=jax.ShapeDtypeStruct((Mp, Np), out_dtype),
        grid=grid,
        in_specs=[
            pl.BlockSpec((tm, tk), lambda i, j, k: (i, k)),
            pl.BlockSpec((tk, tn), lambda i, j, k: (k, j)),
            pl.BlockSpec((1, tn), lambda i, j, k: (0, j)),
        ],
        out_specs=pl.BlockSpec((tm, tn), lambda i, j, k: (i, j)),
        scratch_shapes=scratch_shapes,
        compiler_params=pltpu.CompilerParams(
            dimension_semantics=("parallel", "parallel", "arbitrary"),
            vmem_limit_bytes=vmem_limit,
        ),
    )(x, w_t, b2)

    if (Mp, Np) != (M, N):
        out = out[:M, :N]
    return out


# ----------------------------------------------------------------------------
# Module wrapper matching the PyTorch `Linear` class:
#   nn.Linear(in_features, out_features, bias), xavier_uniform_ weight,
#   zeros_ bias; forward(x) = x @ W.T + b over arbitrary leading dims.
# ----------------------------------------------------------------------------
class PallasLinear:
    def __init__(self, key, in_features, out_features, bias=True, *,
                 compute_dtype=jnp.bfloat16, out_dtype=jnp.float32):
        limit = math.sqrt(6.0 / (in_features + out_features))  # xavier_uniform_
        w = jax.random.uniform(
            key, (out_features, in_features), jnp.float32, -limit, limit
        )
        w_t = jnp.transpose(w)                       # (K, N): lane axis = out
        self.w_t_f32 = w_t                           # f32 reference copy
        self.b = jnp.zeros((out_features,), jnp.float32) if bias else None

        # One-time pad + cast of the weight/bias (done at construction, not
        # per forward call).
        Kp = _round_up(in_features, 128)
        Np = _round_up(out_features, 128)
        if (Kp, Np) != (in_features, out_features):
            w_t = jnp.pad(w_t, ((0, Kp - in_features), (0, Np - out_features)))
        self.w_t_padded = w_t.astype(compute_dtype)
        b_full = self.b if self.b is not None else jnp.zeros(
            (out_features,), jnp.float32)
        if Np != out_features:
            b_full = jnp.pad(b_full, (0, Np - out_features))
        self.b_padded = b_full.reshape(1, Np)

        self.in_features = in_features
        self.out_features = out_features
        self.compute_dtype = compute_dtype
        self.out_dtype = out_dtype

    def __call__(self, x):
        lead = x.shape[:-1]
        x2 = x.reshape(-1, self.in_features).astype(self.compute_dtype)
        y = pallas_linear(x2, self.w_t_padded, self.b_padded,
                          out_dtype=self.out_dtype)
        y = y[:, : self.out_features]
        return y.reshape(*lead, self.out_features)


# ----------------------------------------------------------------------------
if __name__ == "__main__":
    key = jax.random.PRNGKey(0)
    k_w1, k_x1, k_w2, k_x2, k_w3, k_x3 = jax.random.split(key, 6)
    HI = jax.lax.Precision.HIGHEST

    # Case 1: module-sized example (batch=2, seq=8, hidden=32 -> 64 features).
    lin1 = PallasLinear(k_w1, 32, 64, bias=True)
    x1 = jax.random.normal(k_x1, (2, 8, 32), jnp.float32)
    y1 = jax.block_until_ready(lin1(x1))
    assert y1.shape == (2, 8, 64), y1.shape
    ref1 = jnp.dot(x1.reshape(-1, 32), lin1.w_t_f32, precision=HI) + lin1.b
    assert jnp.allclose(y1.reshape(-1, 64), ref1, atol=3e-2, rtol=3e-2)

    # Case 2: non-multiple M (300) and K=384 — adaptive tiles (tm=304, tk=384).
    lin2 = PallasLinear(k_w2, 384, 512, bias=True)
    x2 = jax.random.normal(k_x2, (300, 384), jnp.float32)
    y2 = jax.block_until_ready(lin2(x2))
    assert y2.shape == (300, 512), y2.shape
    ref2 = jnp.dot(x2, lin2.w_t_f32, precision=HI) + lin2.b
    assert jnp.allclose(y2, ref2, atol=5e-2, rtol=5e-2)

    # Case 3: multi-step K and N grid (K=1024 -> 2 K steps, N=768 -> 2 N tiles).
    lin3 = PallasLinear(k_w3, 1024, 768, bias=True)
    x3 = jax.random.normal(k_x3, (256, 1024), jnp.float32)
    y3 = jax.block_until_ready(lin3(x3))
    assert y3.shape == (256, 768), y3.shape
    ref3 = jnp.dot(x3, lin3.w_t_f32, precision=HI) + lin3.b
    assert jnp.allclose(y3, ref3, atol=6e-2, rtol=6e-2)

    # Case 4: bf16 output path (scratch-accumulator kernel variant).
    y4 = jax.block_until_ready(
        pallas_linear(x3.astype(jnp.bfloat16), lin3.w_t_padded, lin3.b_padded,
                      out_dtype=jnp.bfloat16)
    )
    assert y4.shape == (256, 768), y4.shape
    assert jnp.allclose(y4.astype(jnp.float32), ref3, atol=1e-1, rtol=1e-1)

    assert bool(jnp.all(jnp.isfinite(y1)))
    assert bool(jnp.all(jnp.isfinite(y2)))
    assert bool(jnp.all(jnp.isfinite(y3)))
    assert bool(jnp.all(jnp.isfinite(y4.astype(jnp.float32))))
    print("KERNEL_OK")
</pallas_src>

<mosaic_0001>
module attributes {stable_mosaic.version = 11 : i64} {
  func.func @_linear_kernel_inplace(%arg0: i32, %arg1: i32, %arg2: i32, %arg3: memref<16x128xbf16, #tpu.memory_space<vmem>>, %arg4: memref<128x128xbf16, #tpu.memory_space<vmem>>, %arg5: memref<1x128xf32, #tpu.memory_space<vmem>>, %arg6: memref<16x128xf32, #tpu.memory_space<vmem>>) attributes {dimension_semantics = [#tpu.dimension_semantics<parallel>, #tpu.dimension_semantics<parallel>, #tpu.dimension_semantics<arbitrary>], iteration_bounds = array<i64: 1, 1, 1>, scalar_prefetch = 0 : i64, scratch_operands = 0 : i64, tpu.core_type = #tpu.core_type<tc>, window_params = [{transform_indices = @transform_0, window_bounds = array<i64: 16, 128>}, {transform_indices = @transform_1, window_bounds = array<i64: 128, 128>}, {transform_indices = @transform_2, window_bounds = array<i64: 1, 128>}, {transform_indices = @transform_3, window_bounds = array<i64: 16, 128>}]} {
    %c0_i32 = arith.constant 0 : i32
    %0 = arith.cmpi eq, %arg2, %c0_i32 : i32
    %1 = arith.extui %0 : i1 to i32
    %c0_i32_0 = arith.constant 0 : i32
    %2 = arith.cmpi ne, %1, %c0_i32_0 : i32
    scf.if %2 {
      %cst_10 = arith.constant 0.000000e+00 : f32
      %12 = vector.broadcast %cst_10 : f32 to vector<16x128xf32>
      %c0_11 = arith.constant 0 : index
      %c0_12 = arith.constant 0 : index
      %13 = vector.load %arg6[%c0_11, %c0_12] : memref<16x128xf32, #tpu.memory_space<vmem>>, vector<16x128xf32>
      tpu.vector_store %arg6[%c0_11, %c0_12], %12 {strides = array<i32>} : memref<16x128xf32, #tpu.memory_space<vmem>>, vector<16x128xf32>,
    } else {
    }
    %c0 = arith.constant 0 : index
    %c0_1 = arith.constant 0 : index
    %3 = vector.load %arg6[%c0, %c0_1] : memref<16x128xf32, #tpu.memory_space<vmem>>, vector<16x128xf32>
    %c0_2 = arith.constant 0 : index
    %c0_3 = arith.constant 0 : index
    %4 = vector.load %arg3[%c0_2, %c0_3] : memref<16x128xbf16, #tpu.memory_space<vmem>>, vector<16x128xbf16>
    %c0_4 = arith.constant 0 : index
    %c0_5 = arith.constant 0 : index
    %5 = vector.load %arg4[%c0_4, %c0_5] : memref<128x128xbf16, #tpu.memory_space<vmem>>, vector<128x128xbf16>
    %cst = arith.constant dense<0.000000e+00> : vector<16x128xf32>
    %6 = tpu.matmul %4, %5, %cst {dimension_numbers = #tpu.dot_dimension_numbers<[1], [0], [0], [1], [0, 0, 1, 1], [], []>} : vector<16x128xbf16>, vector<128x128xbf16>, vector<16x128xf32> -> vector<16x128xf32>
    %7 = arith.addf %3, %6 : vector<16x128xf32>
    %c0_6 = arith.constant 0 : index
    %c0_7 = arith.constant 0 : index
    %8 = vector.load %arg6[%c0_6, %c0_7] : memref<16x128xf32, #tpu.memory_space<vmem>>, vector<16x128xf32>
    tpu.vector_store %arg6[%c0_6, %c0_7], %7 {strides = array<i32>} : memref<16x128xf32, #tpu.memory_space<vmem>>, vector<16x128xf32>,
    %c0_i32_8 = arith.constant 0 : i32
    %9 = arith.cmpi eq, %arg2, %c0_i32_8 : i32
    %10 = arith.extui %9 : i1 to i32
    %c0_i32_9 = arith.constant 0 : i32
    %11 = arith.cmpi ne, %10, %c0_i32_9 : i32
    scf.if %11 {
      %c0_10 = arith.constant 0 : index
      %c0_11 = arith.constant 0 : index
      %12 = vector.load %arg6[%c0_10, %c0_11] : memref<16x128xf32, #tpu.memory_space<vmem>>, vector<16x128xf32>
      %c0_12 = arith.constant 0 : index
      %c0_13 = arith.constant 0 : index
      %13 = vector.load %arg5[%c0_12, %c0_13] : memref<1x128xf32, #tpu.memory_space<vmem>>, vector<1x128xf32>
      %14 = vector.broadcast %13 : vector<1x128xf32> to vector<16x128xf32>
      %15 = arith.addf %12, %14 : vector<16x128xf32>
      %c0_14 = arith.constant 0 : index
      %c0_15 = arith.constant 0 : index
      %16 = vector.load %arg6[%c0_14, %c0_15] : memref<16x128xf32, #tpu.memory_space<vmem>>, vector<16x128xf32>
      tpu.vector_store %arg6[%c0_14, %c0_15], %15 {strides = array<i32>} : memref<16x128xf32, #tpu.memory_space<vmem>>, vector<16x128xf32>,
    } else {
    }
    return
  }
  func.func @transform_0(%arg0: i32, %arg1: i32, %arg2: i32) -> (i32, i32) {
    %c0_i32 = arith.constant 0 : i32
    return %arg0, %arg2 : i32, i32
  }
  func.func @transform_1(%arg0: i32, %arg1: i32, %arg2: i32) -> (i32, i32) {
    %c0_i32 = arith.constant 0 : i32
    return %arg2, %arg1 : i32, i32
  }
  func.func @transform_2(%arg0: i32, %arg1: i32, %arg2: i32) -> (i32, i32) {
    %c0_i32 = arith.constant 0 : i32
    %c0_i32_0 = arith.constant 0 : i32
    return %c0_i32, %arg1 : i32, i32
  }
  func.func @transform_3(%arg0: i32, %arg1: i32, %arg2: i32) -> (i32, i32) {
    %c0_i32 = arith.constant 0 : i32
    return %arg0, %arg1 : i32, i32
  }
}

</mosaic_0001>

<bundles_post_ra>
// kernel: tpu_custom_call.1
= control target key start
LH: loop header
LB: loop body
LE: loop exit
PB: predicated region body
PF: predicated region fallthrough
CT: control target
= control target key end

     0   :  { %8 = vsyncpa [#allocation3], 0  ;;  %s349_s0 = inlined_call_operand.hbm [shape: bf16[16,128], index: 0, kind: input, shape index: {}]   ;;  %s350_s1 = inlined_call_operand.hbm [shape: bf16[128,128], index: 1, kind: input, shape index: {}]   ;;  %s351_s2 = inlined_call_operand.vmem [shape: f32[1,128], index: 2, kind: input, shape index: {}]   ;;  %s352_s3 = inlined_call_operand.hbm [shape: f32[16,128], index: 3, kind: output, shape index: {}]  }
   0x1   :  { %9 = vsyncpa [#allocation6], 0 }
   0x2   :  { %10 = vsyncpa [#allocation4], 0  ;;  %s15_s14 = sshll.u32 %s349_s0, 4  ;;  %s310_s15 = smov [#allocation2]   ;;  %s16_s14 = int_to_ptr.hbm [resolvable:$true] %s15_s14 }
   0x3   :  { %s17_s16 = sshll.u32 %s310_s15, 4  ;;  %s28_s19 = sshll.u32 %s350_s1, 4  ;;  %s18_s16 = int_to_ptr.vmem [resolvable:$true] %s17_s16  ;;  %s29_s19 = int_to_ptr.hbm [resolvable:$true] %s28_s19 }
   0x4   :  { %s311_s20 = smov 64   ;;  %s312_s21 = smov 4  }
   0x5   :  { %23 = dma.hbm_to_vmem [thread:$0]  %s16_s14, 128, %s18_s16, [#allocation3], %s311_s20, %s311_s20, %s312_s21  }
   0x6   :  { %s313_s22 = smov [#allocation5]  }
   0x7   :  { %s30_s23 = sshll.u32 %s313_s22, 4  ;;  %s31_s23 = int_to_ptr.vmem [resolvable:$true] %s30_s23 }
   0x8   :  { %36 = dma.hbm_to_vmem [thread:$0]  %s29_s19, 1024, %s31_s23, [#allocation6], %s311_s20, %s311_s20, %s312_s21  }
   0x9   :  { %304 = dma.done.wait [#allocation3], 128  }
   0xa   :  { %305 = vsyncadd [#allocation3], 4294967168 }
   0xb   :  { %306 = dma.done.wait [#allocation6], 1024  }
   0xc   :  { %307 = vsyncadd [#allocation6], 4294966272  ;;  %v222_v0 = vld [vmem:[#allocation5 + $0x38] sm:$0xff]  ;;  %v221_v1 = vld [vmem:[#allocation5 + $0x30] sm:$0xff]  ;;  %s314_s24 = smov [#allocation7]   ;;  %s164_s28 = sshll.u32 %s352_s3, 4  ;;  %s165_s28 = int_to_ptr.hbm [resolvable:$true] %s164_s28 }
   0xd   :  { %127 = vmatpush.bf16.msra.mxu0 %v222_v0  ;;  %v220_v2 = vld [vmem:[#allocation5 + $0x28] sm:$0xff]  ;;  %v219_v3 = vld [vmem:[#allocation5 + $0x20] sm:$0xff]  ;;  %v218_v4 = vld [vmem:[#allocation5 + $0x18] sm:$0xff]  ;;  %s162_s25 = sshll.u32 %s314_s24, 4  ;;  %s315_s29 = smov 128   ;;  %s163_s25 = int_to_ptr.vmem [resolvable:$true] %s162_s25 }
   0xe   :  { %v217_v5 = vld [vmem:[#allocation5 + $0x10] sm:$0xff]  ;;  %v216_v6 = vld [vmem:[#allocation5 + $0x8] sm:$0xff]  ;;  %v215_v7 = vld [vmem:[#allocation5] sm:$0xff]  ;;  %s316_s30 = smov 8  }
   0xf   :  { %v214_v8 = vld [vmem:[#allocation2] sm:$0xff] }
  0x10   :  { %v231_v9 = vld [vmem:[%s351_s2] ss:$0 sm:$0xff] }
  0x11   :  { %128 = vmatpush.bf16.msra.mxu0 %v221_v1 }
  0x15   :  { %129 = vmatpush.bf16.msra.mxu0 %v220_v2 }
  0x19   :  { %130 = vmatpush.bf16.msra.mxu0 %v219_v3 }
  0x1d   :  { %131 = vmatpush.bf16.msra.mxu0 %v218_v4 }
  0x21   :  { %132 = vmatpush.bf16.msra.mxu0 %v217_v5 }
  0x25   :  { %133 = vmatpush.bf16.msra.mxu0 %v216_v6 }
  0x29   :  { %134 = vmatpush.bf16.msra.mxu0 %v215_v7 }
  0x2c   :  { %135 = vmatmul.bf16.vlgmr.msra.gmra.mxu0 %v214_v8 }
  0xa9   :  { %v136_v10 = vpop.f32.mrf.mxu0 }
  0xaa   :  { %v154_v11 = vadd.f32 %v231_v9, %v136_v10 }
  0xac   :  { %156 = vst [vmem:[#allocation7] sm:$0xff] %v154_v11 }
  0xb1   :  { %v138_v12 = vpop.f32.mrf.mxu0 }
  0xb2   :  { %v155_v13 = vadd.f32 %v231_v9, %v138_v12 }
  0xb4   :  { %157 = vst [vmem:[#allocation7 + $0x8] sm:$0xff] %v155_v13 }
  0xb5   :  { %170 = dma.vmem_to_hbm [thread:$0]  %s163_s25, 256, %s165_s28, [#allocation4], %s315_s29, %s315_s29, %s316_s30  }
  0xb6   :  { %308 = dma.done.wait [#allocation4], 256  }
  0xb7   :  { %309 = vsyncadd [#allocation4], 4294967040 }
  0xb8   :  { %175 = vsyncpa [#allocation3], 1 }
  0xb9   :  { %176 = vsyncpa [#allocation6], 1 }
  0xba   :  { %177 = vsyncpa [#allocation4], 1 }

</bundles_post_ra>
